<compile_context>
chip_gen: v5e
topology: v5e:2x2
jax: 0.10.0
libtpu: 0.0.40
codegen_flags: <defaults>
</compile_context>

<pallas_src>
import jax
import jax.numpy as jnp
from jax.experimental import pallas as pl
from jax.experimental.pallas import tpu as pltpu


_LANE = 128      # TPU lane width: label / feature dims padded to this
_SUBLANE = 8     # TPU sublane count: batch tile multiple


def _round_up(x, m):
    return (x + m - 1) // m * m


# ----------------------------------------------------------------------------
# Pallas kernel: one fused (TB, K) @ (K, N) + bias -> (TB, N)
# ----------------------------------------------------------------------------
def _fused_head_kernel(feat_ref, w_ref, b_ref, out_ref):
    # bf16 operands -> f32 accumulation on the MXU; f32 bias add on the VPU.
    acc = jnp.dot(feat_ref[...], w_ref[...], preferred_element_type=jnp.float32)
    out_ref[...] = (acc + b_ref[...]).astype(out_ref.dtype)


def multimodal_fusion(feat, w_fused, b_fused, *, num_labels, batch_tile=_SUBLANE):
    """feat (B, Ht+Hv) f32, w_fused (Ht+Hv, L), b_fused (1, L) -> (B, L) f32."""
    B, K = feat.shape
    Bp = _round_up(max(B, batch_tile), batch_tile)
    Kp = _round_up(K, _LANE)
    Np = _round_up(num_labels, _LANE)

    # Lane/sublane-dense, bf16 MXU operands (zero padding leaves results exact).
    feat_p = jnp.zeros((Bp, Kp), jnp.bfloat16).at[:B, :K].set(
        feat.astype(jnp.bfloat16))
    w_p = jnp.zeros((Kp, Np), jnp.bfloat16).at[:K, :num_labels].set(
        w_fused.astype(jnp.bfloat16))
    b_p = jnp.zeros((1, Np), jnp.float32).at[:, :num_labels].set(
        b_fused.astype(jnp.float32))

    grid = (Bp // batch_tile,)
    out_p = pl.pallas_call(
        _fused_head_kernel,
        out_shape=jax.ShapeDtypeStruct((Bp, Np), jnp.float32),
        grid_spec=pltpu.PrefetchScalarGridSpec(
            num_scalar_prefetch=0,
            grid=grid,
            in_specs=[
                pl.BlockSpec((batch_tile, Kp), lambda i: (i, 0)),  # batch-tiled
                pl.BlockSpec((Kp, Np), lambda i: (0, 0)),          # weight resident
                pl.BlockSpec((1, Np), lambda i: (0, 0)),           # bias resident
            ],
            out_specs=pl.BlockSpec((batch_tile, Np), lambda i: (i, 0)),
        ),
        compiler_params=pltpu.CompilerParams(
            dimension_semantics=("parallel",),   # shard batch across TCs on v7x
        ),
    )(feat_p, w_p, b_p)
    return out_p[:B, :num_labels]


# ----------------------------------------------------------------------------
# Offline algebraic fusion of the three Linear layers
# ----------------------------------------------------------------------------
def fuse_head_params(params):
    L = params["bc"].shape[-1]
    wc_t = params["wc"][:L]          # rows of the fusion Linear hit by text logits
    wc_v = params["wc"][L:]          # rows hit by video logits
    w_fused = jnp.concatenate(
        [params["wt"] @ wc_t, params["wv"] @ wc_v], axis=0)            # (Ht+Hv, L)
    b_fused = params["bt"] @ wc_t + params["bv"] @ wc_v + params["bc"]  # (1, L)
    return w_fused, b_fused


# ----------------------------------------------------------------------------
# JAX glue: synthetic encoders (stand-ins for RoBERTa / VideoMAE backbones)
# ----------------------------------------------------------------------------
def encode_text(input_ids, attention_mask, emb_table):
    """input_ids (B,S) int32, attention_mask (B,S) -> pooled (B, Ht)."""
    tok = jnp.take(emb_table, input_ids, axis=0)                 # (B, S, Ht)
    m = attention_mask[..., None].astype(jnp.float32)            # (B, S, 1)
    return (tok * m).sum(axis=1) / jnp.maximum(m.sum(axis=1), 1.0)


def encode_video(pixel_values):
    """pixel_values (B, T, C, H, W) -> pooled (B, T*C)."""
    feat = pixel_values.astype(jnp.float32).mean(axis=(-1, -2))  # (B, T, C)
    return feat.reshape(feat.shape[0], -1)                       # (B, T*C)


def multimodal_classifier_forward(inp_px, inp_ids, am, ls, params):
    # `ls` (labels) only feed the sub-models' losses in the original module;
    # the returned value depends solely on the logits, so labels are ignored.
    del ls
    tfeat = encode_text(inp_ids, am, params["emb"])          # (B, Ht)
    vfeat = encode_video(inp_px)                             # (B, Hv)
    feat = jnp.concatenate([tfeat, vfeat], axis=1)           # (B, Ht+Hv)
    w_fused, b_fused = fuse_head_params(params)
    L = params["bc"].shape[-1]
    return multimodal_fusion(feat, w_fused, b_fused, num_labels=L)


# Pure-JAX reference of the original (un-fused) head, for a sanity check.
def reference_forward(inp_px, inp_ids, am, params):
    tfeat = encode_text(inp_ids, am, params["emb"])
    vfeat = encode_video(inp_px)
    x1 = tfeat @ params["wt"] + params["bt"]
    x2 = vfeat @ params["wv"] + params["bv"]
    combined = jnp.concatenate([x1, x2], axis=1)
    return combined @ params["wc"] + params["bc"]


# ----------------------------------------------------------------------------
# Deterministic parameter init
# ----------------------------------------------------------------------------
def init_params(key, *, vocab, hidden_text, hidden_video, num_labels):
    ks = jax.random.split(key, 7)
    s = 0.02
    return {
        "emb": s * jax.random.normal(ks[0], (vocab, hidden_text), jnp.float32),
        # text head: (Ht, L)   (PyTorch Linear(Ht, L) stored transposed)
        "wt": s * jax.random.normal(ks[1], (hidden_text, num_labels), jnp.float32),
        "bt": s * jax.random.normal(ks[2], (1, num_labels), jnp.float32),
        # video head: (Hv, L)
        "wv": s * jax.random.normal(ks[3], (hidden_video, num_labels), jnp.float32),
        "bv": s * jax.random.normal(ks[4], (1, num_labels), jnp.float32),
        # fusion classifier: Linear(2L, L)
        "wc": s * jax.random.normal(ks[5], (2 * num_labels, num_labels), jnp.float32),
        "bc": s * jax.random.normal(ks[6], (1, num_labels), jnp.float32),
    }


# ----------------------------------------------------------------------------
if __name__ == "__main__":
    key = jax.random.PRNGKey(0)

    B, num_labels = 2, 4
    num_frames, C, H, W = 8, 3, 16, 16
    seq, vocab, hidden_text = 8, 32, 32
    hidden_video = num_frames * C  # 24

    k_px, k_ids, k_am, k_ls, k_par = jax.random.split(key, 5)

    inp_px = jax.random.normal(k_px, (B, num_frames, C, H, W), jnp.float32)
    inp_ids = jax.random.randint(k_ids, (B, seq), 0, vocab, jnp.int32)
    am = (jax.random.uniform(k_am, (B, seq)) > 0.2).astype(jnp.int32)
    ls = jax.random.randint(k_ls, (B,), 0, num_labels, jnp.int32)

    params = init_params(k_par, vocab=vocab, hidden_text=hidden_text,
                         hidden_video=hidden_video, num_labels=num_labels)

    out = multimodal_classifier_forward(inp_px, inp_ids, am, ls, params)
    out = jax.block_until_ready(out)

    assert out.shape == (B, num_labels), out.shape
    assert bool(jnp.all(jnp.isfinite(out)))

    # Loose numerical sanity check vs the un-fused f32 reference (bf16 MXU
    # operands + algebraic re-association change rounding slightly).
    ref = jax.block_until_ready(reference_forward(inp_px, inp_ids, am, params))
    assert bool(jnp.allclose(out, ref, atol=2e-3, rtol=5e-2)), (out, ref)

    print("KERNEL_OK")
</pallas_src>

<mosaic_0001>
module attributes {stable_mosaic.version = 11 : i64} {
  func.func @_fused_head_kernel(%arg0: i32, %arg1: memref<8x128xbf16, #tpu.memory_space<vmem>>, %arg2: memref<128x128xbf16, #tpu.memory_space<vmem>>, %arg3: memref<1x128xf32, #tpu.memory_space<vmem>>, %arg4: memref<8x128xf32, #tpu.memory_space<vmem>>) attributes {dimension_semantics = [#tpu.dimension_semantics<parallel>], iteration_bounds = array<i64: 1>, scalar_prefetch = 0 : i64, scratch_operands = 0 : i64, tpu.core_type = #tpu.core_type<tc>, window_params = [{transform_indices = @transform_0, window_bounds = array<i64: 8, 128>}, {pipeline_mode = #tpu.pipeline_mode<synchronous>, transform_indices = @transform_1, window_bounds = array<i64: 128, 128>}, {pipeline_mode = #tpu.pipeline_mode<synchronous>, transform_indices = @transform_2, window_bounds = array<i64: 1, 128>}, {transform_indices = @transform_3, window_bounds = array<i64: 8, 128>}]} {
    %c0 = arith.constant 0 : index
    %c0_0 = arith.constant 0 : index
    %0 = vector.load %arg1[%c0, %c0_0] : memref<8x128xbf16, #tpu.memory_space<vmem>>, vector<8x128xbf16>
    %c0_1 = arith.constant 0 : index
    %c0_2 = arith.constant 0 : index
    %1 = vector.load %arg2[%c0_1, %c0_2] : memref<128x128xbf16, #tpu.memory_space<vmem>>, vector<128x128xbf16>
    %cst = arith.constant dense<0.000000e+00> : vector<8x128xf32>
    %2 = tpu.matmul %0, %1, %cst {dimension_numbers = #tpu.dot_dimension_numbers<[1], [0], [0], [1], [0, 0, 1, 1], [], []>} : vector<8x128xbf16>, vector<128x128xbf16>, vector<8x128xf32> -> vector<8x128xf32>
    %c0_3 = arith.constant 0 : index
    %c0_4 = arith.constant 0 : index
    %3 = vector.load %arg3[%c0_3, %c0_4] : memref<1x128xf32, #tpu.memory_space<vmem>>, vector<1x128xf32>
    %4 = vector.broadcast %3 : vector<1x128xf32> to vector<8x128xf32>
    %5 = arith.addf %2, %4 : vector<8x128xf32>
    %c0_5 = arith.constant 0 : index
    %c0_6 = arith.constant 0 : index
    %6 = vector.load %arg4[%c0_5, %c0_6] : memref<8x128xf32, #tpu.memory_space<vmem>>, vector<8x128xf32>
    tpu.vector_store %arg4[%c0_5, %c0_6], %5 {strides = array<i32>} : memref<8x128xf32, #tpu.memory_space<vmem>>, vector<8x128xf32>,
    return
  }
  func.func @transform_0(%arg0: i32) -> (i32, i32) {
    %c0_i32 = arith.constant 0 : i32
    %c0_i32_0 = arith.constant 0 : i32
    return %arg0, %c0_i32 : i32, i32
  }
  func.func @transform_1(%arg0: i32) -> (i32, i32) {
    %c0_i32 = arith.constant 0 : i32
    %c0_i32_0 = arith.constant 0 : i32
    %c0_i32_1 = arith.constant 0 : i32
    return %c0_i32, %c0_i32_0 : i32, i32
  }
  func.func @transform_2(%arg0: i32) -> (i32, i32) {
    %c0_i32 = arith.constant 0 : i32
    %c0_i32_0 = arith.constant 0 : i32
    %c0_i32_1 = arith.constant 0 : i32
    return %c0_i32, %c0_i32_0 : i32, i32
  }
  func.func @transform_3(%arg0: i32) -> (i32, i32) {
    %c0_i32 = arith.constant 0 : i32
    %c0_i32_0 = arith.constant 0 : i32
    return %arg0, %c0_i32 : i32, i32
  }
}

</mosaic_0001>

<bundles_post_ra>
// kernel: tpu_custom_call.1
= control target key start
LH: loop header
LB: loop body
LE: loop exit
PB: predicated region body
PF: predicated region fallthrough
CT: control target
= control target key end

     0   :  { %8 = vsyncpa [#allocation3], 0  ;;  %s307_s0 = inlined_call_operand.hbm [shape: bf16[8,128], index: 0, kind: input, shape index: {}]   ;;  %s308_s1 = inlined_call_operand.hbm [shape: bf16[128,128], index: 1, kind: input, shape index: {}]   ;;  %s309_s2 = inlined_call_operand.vmem [shape: f32[1,128], index: 2, kind: input, shape index: {}]   ;;  %s310_s3 = inlined_call_operand.hbm [shape: f32[8,128], index: 3, kind: output, shape index: {}]  }
   0x1   :  { %9 = vsyncpa [#allocation6], 0 }
   0x2   :  { %10 = vsyncpa [#allocation4], 0  ;;  %s16_s14 = sshll.u32 %s307_s0, 4  ;;  %s270_s15 = smov [#allocation2]   ;;  %s17_s14 = int_to_ptr.hbm [resolvable:$true] %s16_s14 }
   0x3   :  { %s18_s16 = sshll.u32 %s270_s15, 4  ;;  %s26_s19 = sshll.u32 %s308_s1, 4  ;;  %s19_s16 = int_to_ptr.vmem [resolvable:$true] %s18_s16  ;;  %s27_s19 = int_to_ptr.hbm [resolvable:$true] %s26_s19 }
   0x4   :  { %21 = dma.hbm_to_vmem [thread:$0]  %s17_s14, 64, %s19_s16, [#allocation3]  }
   0x5   :  { %s271_s20 = smov [#allocation5]   ;;  %s272_s22 = smov 64  }
   0x6   :  { %s28_s21 = sshll.u32 %s271_s20, 4  ;;  %s273_s23 = smov 4   ;;  %s29_s21 = int_to_ptr.vmem [resolvable:$true] %s28_s21 }
   0x7   :  { %34 = dma.hbm_to_vmem [thread:$0]  %s27_s19, 1024, %s29_s21, [#allocation6], %s272_s22, %s272_s22, %s273_s23  }
   0x8   :  { %264 = dma.done.wait [#allocation3], 64  }
   0x9   :  { %265 = vsyncadd [#allocation3], 4294967232 }
   0xa   :  { %266 = dma.done.wait [#allocation6], 1024  }
   0xb   :  { %267 = vsyncadd [#allocation6], 4294966272  ;;  %v185_v0 = vld [vmem:[#allocation5 + $0x38] sm:$0xff]  ;;  %v184_v1 = vld [vmem:[#allocation5 + $0x30] sm:$0xff]  ;;  %s274_s24 = smov [#allocation7]   ;;  %s135_s28 = sshll.u32 %s310_s3, 4  ;;  %s136_s28 = int_to_ptr.hbm [resolvable:$true] %s135_s28 }
   0xc   :  { %114 = vmatpush.bf16.msra.mxu0 %v185_v0  ;;  %v183_v2 = vld [vmem:[#allocation5 + $0x28] sm:$0xff]  ;;  %v182_v3 = vld [vmem:[#allocation5 + $0x20] sm:$0xff]  ;;  %v181_v4 = vld [vmem:[#allocation5 + $0x18] sm:$0xff]  ;;  %s133_s25 = sshll.u32 %s274_s24, 4  ;;  %s134_s25 = int_to_ptr.vmem [resolvable:$true] %s133_s25 }
   0xd   :  { %v180_v5 = vld [vmem:[#allocation5 + $0x10] sm:$0xff]  ;;  %v179_v6 = vld [vmem:[#allocation5 + $0x8] sm:$0xff]  ;;  %v178_v7 = vld [vmem:[#allocation5] sm:$0xff] }
   0xe   :  { %v45_v8 = vld [vmem:[#allocation2] sm:$0xf] }
   0xf   :  { %v191_v9 = vld [vmem:[%s309_s2] ss:$0 sm:$0xff] }
  0x10   :  { %115 = vmatpush.bf16.msra.mxu0 %v184_v1 }
  0x14   :  { %116 = vmatpush.bf16.msra.mxu0 %v183_v2 }
  0x18   :  { %117 = vmatpush.bf16.msra.mxu0 %v182_v3 }
  0x1c   :  { %118 = vmatpush.bf16.msra.mxu0 %v181_v4 }
  0x20   :  { %119 = vmatpush.bf16.msra.mxu0 %v180_v5 }
  0x24   :  { %120 = vmatpush.bf16.msra.mxu0 %v179_v6 }
  0x28   :  { %121 = vmatpush.bf16.msra.mxu0 %v178_v7 }
  0x2b   :  { %122 = vmatmul.bf16.vlgmr.msra.gmra.mxu0 %v45_v8 }
  0xa8   :  { %v123_v10 = vpop.f32.mrf.mxu0 }
  0xa9   :  { %v124_v11 = vadd.f32 %v191_v9, %v123_v10 }
  0xab   :  { %127 = vst [vmem:[#allocation7] sm:$0xff] %v124_v11 }
  0xac   :  { %138 = dma.vmem_to_hbm [thread:$0]  %s134_s25, 128, %s136_s28, [#allocation4]  }
  0xb0   :  { %v125_v12 = vpop.f32.mrf.mxu0 }
  0xb1   :  { %268 = dma.done.wait [#allocation4], 128  }
  0xb2   :  { %269 = vsyncadd [#allocation4], 4294967168 }
  0xb3   :  { %143 = vsyncpa [#allocation3], 1 }
  0xb4   :  { %144 = vsyncpa [#allocation6], 1 }
  0xb5   :  { %145 = vsyncpa [#allocation4], 1 }

</bundles_post_ra>
